<compile_context>
chip_gen: v5e
topology: v5e:2x2
jax: 0.10.0
libtpu: 0.0.40
codegen_flags: <defaults>
</compile_context>

<pallas_src>
import jax
import jax.numpy as jnp
from jax.experimental import pallas as pl
from jax.experimental.pallas import tpu as pltpu

_LANES = 128


def _round_up(x, m):
    return (x + m - 1) // m * m


def _onehot_species_kernel(zset_ref, species_ref, feat_ref, nonblank_ref):
    """One row-tile of atoms.

    zset_ref     : SMEM (n_species,) int32            (scalar-prefetched species set)
    species_ref  : VMEM (tile_rows, 128) int32        (flattened, lane-dense atoms)
    feat_ref     : VMEM (n_species-1, tile_rows, 128) int8   (channel-first one-hot)
    nonblank_ref : VMEM (tile_rows, 128) int8
    """
    sp = species_ref[...]                              # (tr, 128) int32
    n_species = feat_ref.shape[0] + 1

    # Tiny static loop over the species set: one broadcast compare per species (VPU).
    eqs = [sp == zset_ref[k] for k in range(n_species)]

    found = eqs[0]
    for e in eqs[1:]:
        found = jnp.logical_or(found, e)
    # Z-values not in species_set fall back to index 0 (blank), like the zeros-init zmap.
    blank = jnp.logical_or(eqs[0], jnp.logical_not(found))

    nonblank_ref[...] = jnp.logical_not(blank).astype(jnp.int8)
    # Single contiguous store of all non-blank one-hot planes (channel-first).
    feat_ref[...] = jnp.stack([e.astype(jnp.int8) for e in eqs[1:]], axis=0)


def one_hot_species(species, species_set, *, row_tile=512):
    """Pallas-backed equivalent of OneHotSpecies.forward.

    species     : int array (n_molecules, n_atoms)
    species_set : 1-D iterable of Z values; index 0 is the blank/padding species.
    returns (initial_features bool[B, A, n_species-1], nonblank bool[B, A])
    """
    species_set = jnp.asarray(species_set, dtype=jnp.int32)
    n_species = int(species_set.shape[0])
    species = jnp.asarray(species, dtype=jnp.int32)
    B, A = species.shape
    BA = B * A

    # Lane-dense slab: flatten atoms, pad to whole (rows, 128) tiles.
    rows = pl.cdiv(BA, _LANES)
    # int8 outputs tile as (32, 128); int32 input as (8, 128) -> keep row tile a multiple of 32.
    tr = min(row_tile, _round_up(rows, 32))
    rows_pad = _round_up(rows, tr)
    grid = rows_pad // tr

    slab = jnp.pad(species.reshape(-1), (0, rows_pad * _LANES - BA)).reshape(rows_pad, _LANES)

    feat_cba, nonblank_i8 = pl.pallas_call(
        _onehot_species_kernel,
        out_shape=(
            jax.ShapeDtypeStruct((n_species - 1, rows_pad, _LANES), jnp.int8),
            jax.ShapeDtypeStruct((rows_pad, _LANES), jnp.int8),
        ),
        grid_spec=pltpu.PrefetchScalarGridSpec(
            num_scalar_prefetch=1,                       # species_set -> SMEM scalars
            grid=(grid,),
            in_specs=[pl.BlockSpec((tr, _LANES), lambda i, zset: (i, 0))],
            out_specs=(
                pl.BlockSpec((n_species - 1, tr, _LANES), lambda i, zset: (0, i, 0)),
                pl.BlockSpec((tr, _LANES), lambda i, zset: (i, 0)),
            ),
        ),
        compiler_params=pltpu.CompilerParams(
            dimension_semantics=("parallel",),           # shard row tiles across TCs on v7x
            vmem_limit_bytes=32 * 1024 * 1024,           # tiles are ~0.5 MiB/step; safe on v7x
        ),
    )(species_set, slab)

    # Exactly one fused layout-fix pass per output (slice + transpose + reshape + bool cast
    # fuse into a single XLA copy). The module contract forces the 3-wide channel-last
    # bool layout; doing this inside the kernel would mean masked 3/128-lane stores.
    nonblank = nonblank_i8.reshape(-1)[:BA].reshape(B, A).astype(jnp.bool_)
    initial_features = (
        feat_cba.reshape(n_species - 1, rows_pad * _LANES)[:, :BA]
        .T.reshape(B, A, n_species - 1)
        .astype(jnp.bool_)
    )
    return initial_features, nonblank


def _reference(species, species_set):
    """Pure-JAX mirror of the PyTorch forward for verification."""
    species_set = jnp.asarray(species_set, dtype=jnp.int32)
    n_species = species_set.shape[0]
    max_z = int(jnp.max(species_set))
    zmap = jnp.zeros((max_z + 1,), dtype=jnp.int32).at[species_set].set(
        jnp.arange(n_species, dtype=jnp.int32)
    )
    onehot = jnp.eye(n_species, dtype=jnp.bool_)[zmap[species]]
    nonblank = jnp.logical_not(onehot[:, :, 0])
    initial_features = onehot[:, :, 1:]
    return initial_features, nonblank


if __name__ == "__main__":
    # species_set: 0 = blank/padding atom, then H(1), C(6), O(8)
    species_set = jnp.array([0, 1, 6, 8], dtype=jnp.int32)
    n_species = int(species_set.shape[0])

    key0, key1 = jax.random.split(jax.random.PRNGKey(0))

    # Small example: 2 molecules x 16 atoms, deterministic, with blank padding slots.
    B, A = 2, 16
    idx = jax.random.randint(key0, (B, A), 0, n_species)
    species = species_set[idx]
    species = species.at[:, A - 4:].set(0).astype(jnp.int32)

    feats, nonblank = one_hot_species(species, species_set)
    jax.block_until_ready(feats)
    jax.block_until_ready(nonblank)

    ref_feats, ref_nonblank = _reference(species, species_set)
    assert feats.shape == (B, A, n_species - 1) and feats.dtype == jnp.bool_
    assert nonblank.shape == (B, A) and nonblank.dtype == jnp.bool_
    assert bool(jnp.all(feats == ref_feats))
    assert bool(jnp.all(nonblank == ref_nonblank))

    # Larger check that exercises the gridded pipeline (multiple row tiles + lane padding).
    B2, A2 = 3, 23456
    idx2 = jax.random.randint(key1, (B2, A2), 0, n_species)
    species2 = species_set[idx2].astype(jnp.int32)
    feats2, nonblank2 = one_hot_species(species2, species_set)
    jax.block_until_ready(feats2)
    ref_feats2, ref_nonblank2 = _reference(species2, species_set)
    assert bool(jnp.all(feats2 == ref_feats2))
    assert bool(jnp.all(nonblank2 == ref_nonblank2))

    print("KERNEL_OK")
</pallas_src>

<mosaic_0001>
module attributes {stable_mosaic.version = 11 : i64} {
  func.func @_onehot_species_kernel(%arg0: i32, %arg1: memref<4xi32, #tpu.memory_space<smem>>, %arg2: memref<32x128xi32, #tpu.memory_space<vmem>>, %arg3: memref<3x32x128xi8, #tpu.memory_space<vmem>>, %arg4: memref<32x128xi8, #tpu.memory_space<vmem>>) attributes {dimension_semantics = [#tpu.dimension_semantics<parallel>], iteration_bounds = array<i64: 1>, scalar_prefetch = 1 : i64, scratch_operands = 0 : i64, tpu.core_type = #tpu.core_type<tc>, window_params = [{transform_indices = @transform_0, window_bounds = array<i64: 32, 128>}, {transform_indices = @transform_1, window_bounds = array<i64: 3, 32, 128>}, {transform_indices = @transform_2, window_bounds = array<i64: 32, 128>}]} {
    %c0 = arith.constant 0 : index
    %c0_0 = arith.constant 0 : index
    %0 = vector.load %arg2[%c0, %c0_0] : memref<32x128xi32, #tpu.memory_space<vmem>>, vector<32x128xi32>
    %c0_1 = arith.constant 0 : index
    %1 = memref.load %arg1[%c0_1] : memref<4xi32, #tpu.memory_space<smem>>
    %2 = vector.broadcast %1 : i32 to vector<32x128xi32>
    %3 = arith.cmpi eq, %0, %2 : vector<32x128xi32>
    %c1 = arith.constant 1 : index
    %4 = memref.load %arg1[%c1] : memref<4xi32, #tpu.memory_space<smem>>
    %5 = vector.broadcast %4 : i32 to vector<32x128xi32>
    %6 = arith.cmpi eq, %0, %5 : vector<32x128xi32>
    %c2 = arith.constant 2 : index
    %7 = memref.load %arg1[%c2] : memref<4xi32, #tpu.memory_space<smem>>
    %8 = vector.broadcast %7 : i32 to vector<32x128xi32>
    %9 = arith.cmpi eq, %0, %8 : vector<32x128xi32>
    %c3 = arith.constant 3 : index
    %10 = memref.load %arg1[%c3] : memref<4xi32, #tpu.memory_space<smem>>
    %11 = vector.broadcast %10 : i32 to vector<32x128xi32>
    %12 = arith.cmpi eq, %0, %11 : vector<32x128xi32>
    %13 = arith.ori %3, %6 : vector<32x128xi1>
    %14 = arith.ori %13, %9 : vector<32x128xi1>
    %15 = arith.ori %14, %12 : vector<32x128xi1>
    %cst = arith.constant dense<true> : vector<32x128xi1>
    %16 = arith.xori %15, %cst : vector<32x128xi1>
    %17 = arith.ori %3, %16 : vector<32x128xi1>
    %cst_2 = arith.constant dense<true> : vector<32x128xi1>
    %18 = arith.xori %17, %cst_2 : vector<32x128xi1>
    %19 = arith.extui %18 : vector<32x128xi1> to vector<32x128xi8>
    %c0_3 = arith.constant 0 : index
    %c0_4 = arith.constant 0 : index
    %20 = vector.load %arg4[%c0_3, %c0_4] : memref<32x128xi8, #tpu.memory_space<vmem>>, vector<32x128xi8>
    tpu.vector_store %arg4[%c0_3, %c0_4], %19 {strides = array<i32>} : memref<32x128xi8, #tpu.memory_space<vmem>>, vector<32x128xi8>,
    %21 = arith.extui %6 : vector<32x128xi1> to vector<32x128xi8>
    %22 = arith.extui %9 : vector<32x128xi1> to vector<32x128xi8>
    %23 = arith.extui %12 : vector<32x128xi1> to vector<32x128xi8>
    %24 = vector.shape_cast %21 : vector<32x128xi8> to vector<1x32x128xi8>
    %25 = vector.shape_cast %22 : vector<32x128xi8> to vector<1x32x128xi8>
    %26 = vector.shape_cast %23 : vector<32x128xi8> to vector<1x32x128xi8>
    %27 = tpu.concatenate %24, %25, %26 in 0 : vector<1x32x128xi8>, vector<1x32x128xi8>, vector<1x32x128xi8> -> vector<3x32x128xi8>
    %c0_5 = arith.constant 0 : index
    %c0_6 = arith.constant 0 : index
    %c0_7 = arith.constant 0 : index
    %28 = vector.load %arg3[%c0_5, %c0_6, %c0_7] : memref<3x32x128xi8, #tpu.memory_space<vmem>>, vector<3x32x128xi8>
    tpu.vector_store %arg3[%c0_5, %c0_6, %c0_7], %27 {strides = array<i32>} : memref<3x32x128xi8, #tpu.memory_space<vmem>>, vector<3x32x128xi8>,
    return
  }
  func.func @transform_0(%arg0: i32, %arg1: memref<4xi32, #tpu.memory_space<smem>>) -> (i32, i32) {
    %c0_i32 = arith.constant 0 : i32
    %c0_i32_0 = arith.constant 0 : i32
    return %arg0, %c0_i32 : i32, i32
  }
  func.func @transform_1(%arg0: i32, %arg1: memref<4xi32, #tpu.memory_space<smem>>) -> (i32, i32, i32) {
    %c0_i32 = arith.constant 0 : i32
    %c0_i32_0 = arith.constant 0 : i32
    %c0_i32_1 = arith.constant 0 : i32
    return %c0_i32, %arg0, %c0_i32_0 : i32, i32, i32
  }
  func.func @transform_2(%arg0: i32, %arg1: memref<4xi32, #tpu.memory_space<smem>>) -> (i32, i32) {
    %c0_i32 = arith.constant 0 : i32
    %c0_i32_0 = arith.constant 0 : i32
    return %arg0, %c0_i32 : i32, i32
  }
}

</mosaic_0001>

<bundles_post_ra>
// kernel: tpu_custom_call.1
= control target key start
LH: loop header
LB: loop body
LE: loop exit
PB: predicated region body
PF: predicated region fallthrough
CT: control target
= control target key end

     0   :  { %s261_s15 = smov [#allocation3]   ;;  %s395_s0 = inlined_call_operand.hbm [shape: s32[4], index: 0, kind: input, shape index: {}]   ;;  %s396_s1 = inlined_call_operand.hbm [shape: s32[32,128], index: 1, kind: input, shape index: {}]   ;;  %s397_s2 = inlined_call_operand.hbm [shape: s8[3,32,128], index: 2, kind: output, shape index: {0}]   ;;  %s398_s3 = inlined_call_operand.hbm [shape: s8[32,128], index: 3, kind: output, shape index: {1}]  }
   0x1   :  { %s10_s14 = sshll.u32 %s395_s0, 4  ;;  %s11_s14 = int_to_ptr.hbm [resolvable:$true] %s10_s14 }
   0x2   :  { %13 = dma.hbm_to_smem %s11_s14, 16, %s261_s15, [#allocation2] }
   0x3   :  { %253 = dma.done.wait [#allocation2], 16 }
   0x4   :  { %254 = vsyncadd [#allocation2], 4294967280 }
   0x5   :  { %16 = sfence }
   0x6   :  { %17 = vsyncpa [#allocation5], 0 }
   0x7   :  { %18 = vsyncpa [#allocation6], 0 }
   0x8   :  { %19 = vsyncpa [#allocation9], 0  ;;  %s24_s18 = sshll.u32 %s396_s1, 4  ;;  %s262_s19 = smov [#allocation4]   ;;  %s25_s18 = int_to_ptr.hbm [resolvable:$true] %s24_s18 }
   0x9   :  { %s26_s20 = sshll.u32 %s262_s19, 4  ;;  %s263_s21 = smov 128   ;;  %s27_s20 = int_to_ptr.vmem [resolvable:$true] %s26_s20 }
   0xa   :  { %s264_s22 = smov 8  }
   0xb   :  { %32 = dma.hbm_to_vmem [thread:$0]  %s25_s18, 512, %s27_s20, [#allocation5], %s263_s21, %s263_s21, %s264_s22  }
   0xc   :  { %255 = dma.done.wait [#allocation5], 512  }
   0xd   :  { %256 = vsyncadd [#allocation5], 4294966784  ;;  %s43_s0 = sld [smem:[#allocation3]]  ;;  %v298_v0 = vld [vmem:[#allocation4] sm:$0xff]  ;;  %v300_v1 = vld [vmem:[#allocation4 + $0x8] sm:$0xff]  ;;  %v266_v8 = vmov 0  }
   0xe   :  { %s158_s23 = sld [smem:[#allocation3 + $0x1]]  ;;  %v302_v2 = vld [vmem:[#allocation4 + $0x10] sm:$0xff]  ;;  %v304_v4 = vld [vmem:[#allocation4 + $0x18] sm:$0xff]  ;;  %s267_s1 = smov [#allocation8]  }
   0xf   :  { %s159_s24 = sld [smem:[#allocation3 + $0x2]]  ;;  %s141_s26 = sshll.u32 %s267_s1, 4  ;;  %s142_s26 = int_to_ptr.vmem [resolvable:$true] %s141_s26 }
  0x10   :  { %s160_s25 = sld [smem:[#allocation3 + $0x3]]  ;;  %s143_s29 = sshll.u32 %s398_s3, 4  ;;  %s144_s29 = int_to_ptr.hbm [resolvable:$true] %s143_s29 }
  0x11   :  { %s268_s3 = smov [#allocation7]   ;;  %s129_s6 = sshll.u32 %s397_s2, 4  ;;  %s130_s6 = int_to_ptr.hbm [resolvable:$true] %s129_s6 }
  0x12   :  { %s127_s30 = sshll.u32 %s268_s3, 4  ;;  %s128_s30 = int_to_ptr.vmem [resolvable:$true] %s127_s30 }
  0x13   :  { %v44_v3 = vstv %s43_s0 }
  0x14   :  { %vm402_vm0 = vcmp.eq.s32.totalorder %v298_v0, %v44_v3  ;;  %vm401_vm1 = vcmp.eq.s32.totalorder %v300_v1, %v44_v3  ;;  %v50_v5 = vstv %s158_s23  ;;  %vm404_vm2 = vcmp.eq.s32.totalorder %v302_v2, %v44_v3 }
  0x15   :  { %vm400_vm3 = vcmp.eq.s32.totalorder %v298_v0, %v50_v5  ;;  %vm399_vm4 = vcmp.eq.s32.totalorder %v300_v1, %v50_v5  ;;  %vm403_vm5 = vcmp.eq.s32.totalorder %v302_v2, %v50_v5  ;;  %vm406_vm6 = vcmp.eq.s32.totalorder %v304_v4, %v44_v3 }
  0x16   :  { %vm405_vm7 = vcmp.eq.s32.totalorder %v304_v4, %v50_v5  ;;  %v56_v6 = vstv %s159_s24  ;;  %vm67_vm8 = vmor %vm402_vm0, %vm400_vm3  ;;  %v62_v7 = vstv %s160_s25 }
  0x17   :  { %vm407_vm9 = vcmp.eq.s32.totalorder %v298_v0, %v56_v6  ;;  %vm68_vm10 = vmor %vm401_vm1, %vm399_vm4  ;;  %vm408_vm11 = vcmp.eq.s32.totalorder %v300_v1, %v56_v6  ;;  %vm409_vm13 = vcmp.eq.s32.totalorder %v302_v2, %v56_v6  ;;  %vm410_vm15 = vcmp.eq.s32.totalorder %v304_v4, %v56_v6 }
  0x18   :  { %vm69_vm12 = vmor %vm404_vm2, %vm403_vm5  ;;  %vm411_vm3 = vcmp.eq.s32.totalorder %v298_v0, %v62_v7  ;;  %vm412_vm0 = vcmp.eq.s32.totalorder %v300_v1, %v62_v7  ;;  %vm413_vm2 = vcmp.eq.s32.totalorder %v302_v2, %v62_v7 }
  0x19   :  { %vm70_vm14 = vmor %vm406_vm6, %vm405_vm7  ;;  %vm414_vm6 = vcmp.eq.s32.totalorder %v304_v4, %v62_v7 }
  0x1a   :  { %vm71_vm4 = vmor %vm67_vm8, %vm407_vm9 }
  0x1b   :  { %vm72_vm1 = vmor %vm68_vm10, %vm408_vm11 }
  0x1c   :  { %vm73_vm5 = vmor %vm69_vm12, %vm409_vm13  ;;  %vm265_vm12 = vmmov 1  }
  0x1d   :  { %vm74_vm7 = vmor %vm70_vm14, %vm410_vm15 }
  0x1e   :  { %vm75_vm8 = vmor %vm71_vm4, %vm411_vm3  ;;  %vm415_vm4 = vcmp.eq.s32.totalorder %v298_v0, %v44_v3 }
  0x1f   :  { %vm76_vm9 = vmor %vm72_vm1, %vm412_vm0  ;;  %vm416_vm1 = vcmp.eq.s32.totalorder %v300_v1, %v44_v3 }
  0x20   :  { %vm77_vm10 = vmor %vm73_vm5, %vm413_vm2  ;;  %vm417_vm5 = vcmp.eq.s32.totalorder %v302_v2, %v44_v3 }
  0x21   :  { %vm78_vm11 = vmor %vm74_vm7, %vm414_vm6  ;;  %vm418_vm7 = vcmp.eq.s32.totalorder %v304_v4, %v44_v3 }
  0x22   :  { %vm79_vm13 = vmxor %vm75_vm8, %vm265_vm12 }
  0x23   :  { %vm80_vm14 = vmxor %vm76_vm9, %vm265_vm12 }
  0x24   :  { %vm81_vm15 = vmxor %vm77_vm10, %vm265_vm12 }
  0x25   :  { %vm82_vm3 = vmxor %vm78_vm11, %vm265_vm12 }
  0x26   :  { %vm83_vm0 = vmor %vm415_vm4, %vm79_vm13 }
  0x27   :  { %vm84_vm2 = vmor %vm416_vm1, %vm80_vm14  ;;  %vm419_vm14 = vcmp.eq.s32.totalorder %v298_v0, %v50_v5 }
  0x28   :  { %vm85_vm6 = vmor %vm417_vm5, %vm81_vm15  ;;  %vm420_vm5 = vcmp.eq.s32.totalorder %v300_v1, %v50_v5 }
  0x29   :  { %vm86_vm8 = vmor %vm418_vm7, %vm82_vm3 }
  0x2a   :  { %vm87_vm9 = vmxor %vm83_vm0, %vm265_vm12  ;;  %vm421_vm0 = vcmp.eq.s32.totalorder %v302_v2, %v50_v5 }
  0x2b   :  { %vm88_vm10 = vmxor %vm84_vm2, %vm265_vm12  ;;  %vm422_vm2 = vcmp.eq.s32.totalorder %v304_v4, %v50_v5 }
  0x2c   :  { %vm89_vm11 = vmxor %vm85_vm6, %vm265_vm12  ;;  %vm423_vm6 = vcmp.eq.s32.totalorder %v298_v0, %v56_v6 }
  0x2d   :  { %vm90_vm4 = vmxor %vm86_vm8, %vm265_vm12  ;;  %vm424_vm12 = vcmp.eq.s32.totalorder %v300_v1, %v56_v6 }
  0x2e   :  { %vm91_vm13 = vmpackc.low %vm88_vm10, %vm87_vm9  ;;  %vm425_vm9 = vcmp.eq.s32.totalorder %v302_v2, %v56_v6  ;;  %vm426_vm10 = vcmp.eq.s32.totalorder %v304_v4, %v56_v6 }
  0x2f   :  { %vm92_vm1 = vmpackc.low %vm90_vm4, %vm89_vm11  ;;  %v93_v9 = vsel %vm91_vm13, 16711935, %v266_v8  ;;  %vm427_vm4 = vcmp.eq.s32.totalorder %v298_v0, %v62_v7  ;;  %vm428_vm13 = vcmp.eq.s32.totalorder %v300_v1, %v62_v7 }
  0x30   :  { %v94_v10 = vsel %vm92_vm1, 16711935, %v266_v8  ;;  %vm99_vm15 = vmpackc.low %vm420_vm5, %vm419_vm14  ;;  %vm429_vm5 = vcmp.eq.s32.totalorder %v302_v2, %v62_v7 }
  0x31   :  { %v95_v11 = vpack.c.b8 %v94_v10, %v93_v9  ;;  %vm100_vm3 = vmpackc.low %vm422_vm2, %vm421_vm0  ;;  %v101_v12 = vsel %vm99_vm15, 16711935, %v266_v8  ;;  %vm430_vm15 = vcmp.eq.s32.totalorder %v304_v4, %v62_v7 }
  0x32   :  { %v102_v13 = vsel %vm100_vm3, 16711935, %v266_v8  ;;  %vm106_vm7 = vmpackc.low %vm424_vm12, %vm423_vm6 }
  0x33   :  { %vm96_vm8 = vnez %v95_v11  ;;  %v103_v14 = vpack.c.b8 %v102_v13, %v101_v12  ;;  %vm107_vm11 = vmpackc.low %vm426_vm10, %vm425_vm9  ;;  %v108_v15 = vsel %vm106_vm7, 16711935, %v266_v8 }
  0x34   :  { %v97_v16 = vsel %vm96_vm8, 16843009, %v266_v8  ;;  %v109_v17 = vsel %vm107_vm11, 16711935, %v266_v8  ;;  %vm113_vm1 = vmpackc.low %vm428_vm13, %vm427_vm4 }
  0x35   :  { %98 = vst [vmem:[#allocation8] sm:$0xff] %v97_v16  ;;  %vm104_vm14 = vnez %v103_v14  ;;  %v110_v18 = vpack.c.b8 %v109_v17, %v108_v15  ;;  %vm114_vm0 = vmpackc.low %vm430_vm15, %vm429_vm5  ;;  %v115_v19 = vsel %vm113_vm1, 16711935, %v266_v8 }
  0x36   :  { %v105_v20 = vsel %vm104_vm14, 16843009, %v266_v8  ;;  %v116_v21 = vsel %vm114_vm0, 16711935, %v266_v8  ;;  %146 = dma.vmem_to_hbm [thread:$0]  %s142_s26, 128, %s144_s29, [#allocation9]  }
  0x37   :  { %120 = vst [vmem:[#allocation7] sm:$0xff] %v105_v20  ;;  %vm111_vm2 = vnez %v110_v18  ;;  %v117_v22 = vpack.c.b8 %v116_v21, %v115_v19 }
  0x38   :  { %v112_v23 = vsel %vm111_vm2, 16843009, %v266_v8 }
  0x39   :  { %121 = vst [vmem:[#allocation7 + $0x8] sm:$0xff] %v112_v23  ;;  %vm118_vm3 = vnez %v117_v22 }
  0x3a   :  { %v119_v24 = vsel %vm118_vm3, 16843009, %v266_v8 }
  0x3b   :  { %122 = vst [vmem:[#allocation7 + $0x10] sm:$0xff] %v119_v24 }
  0x3c   :  { %135 = dma.vmem_to_hbm [thread:$0]  %s128_s30, 384, %s130_s6, [#allocation6], %s263_s21, %s263_s21, %s264_s22  }
  0x3d   :  { %257 = dma.done.wait [#allocation6], 384  }
  0x3e   :  { %258 = vsyncadd [#allocation6], 4294966912 }
  0x3f   :  { %259 = dma.done.wait [#allocation9], 128  }
  0x40   :  { %260 = vsyncadd [#allocation9], 4294967168 }
  0x41   :  { %155 = vsyncpa [#allocation5], 1 }
  0x42   :  { %156 = vsyncpa [#allocation6], 1 }
  0x43   :  { %157 = vsyncpa [#allocation9], 1 }

</bundles_post_ra>
